<compile_context>
chip_gen: v5e
topology: v5e:2x2
jax: 0.10.0
libtpu: 0.0.40
codegen_flags: <defaults>
</compile_context>

<pallas_src>
import jax
import jax.numpy as jnp
from jax.experimental import pallas as pl
from jax.experimental.pallas import tpu as pltpu


def _flatten_copy_kernel(x_ref, o_ref):
    # Pure data movement: one lane-dense tile of the flattened activation.
    o_ref[...] = x_ref[...]


def _pick_tile(dim, preferred, align):
    """Largest multiple of `align` that is <= `preferred` and divides `dim`.

    Falls back to the full extent when `dim` is not `align`-aligned, so no
    padding or tail masking is ever needed (full-extent block dims are always
    legal on TPU regardless of the (8, 128) divisibility rule).
    """
    if dim % align != 0:
        return dim
    t = min(preferred, dim)
    t -= t % align
    while dim % t != 0:
        t -= align
    return t


def flatten(x):
    """Pallas equivalent of `x.view(x.shape[0], -1)` for a contiguous input."""
    n = x.shape[0]
    d = 1
    for s in x.shape[1:]:
        d *= s

    # Row-major reshape == torch .view on a contiguous tensor; metadata-only
    # in XLA (no HBM traffic). The Pallas kernel below does the actual tiled,
    # pipelined materialization of the (n, d) output.
    x2 = x.reshape(n, d)

    tn = _pick_tile(n, 256, 8)      # sublane axis tile
    td = _pick_tile(d, 2048, 128)   # lane axis tile: keep multiple of 128
    grid = (n // tn, d // td)

    return pl.pallas_call(
        _flatten_copy_kernel,
        grid=grid,
        out_shape=jax.ShapeDtypeStruct((n, d), x.dtype),
        in_specs=[pl.BlockSpec((tn, td), lambda i, j: (i, j))],
        out_specs=pl.BlockSpec((tn, td), lambda i, j: (i, j)),
        compiler_params=pltpu.CompilerParams(
            dimension_semantics=("parallel", "parallel")),
    )(x2)


if __name__ == "__main__":
    key = jax.random.PRNGKey(0)
    # Small shapes consistent with the module: batch=2, channels=4, spatial=16.
    x = jax.random.normal(key, (2, 4, 16, 16), jnp.float32)

    out = jax.block_until_ready(jax.jit(flatten)(x))

    assert out.shape == (2, 4 * 16 * 16), out.shape
    ref = x.reshape(x.shape[0], -1)
    assert bool(jnp.array_equal(out, ref))
    print("KERNEL_OK")
</pallas_src>

<mosaic_0001>
module attributes {stable_mosaic.version = 11 : i64} {
  func.func @_flatten_copy_kernel(%arg0: i32, %arg1: i32, %arg2: memref<2x1024xf32, #tpu.memory_space<vmem>>, %arg3: memref<2x1024xf32, #tpu.memory_space<vmem>>) attributes {dimension_semantics = [#tpu.dimension_semantics<parallel>, #tpu.dimension_semantics<parallel>], iteration_bounds = array<i64: 1, 1>, scalar_prefetch = 0 : i64, scratch_operands = 0 : i64, tpu.core_type = #tpu.core_type<tc>, window_params = [{transform_indices = @transform_0, window_bounds = array<i64: 2, 1024>}, {transform_indices = @transform_1, window_bounds = array<i64: 2, 1024>}]} {
    %c0 = arith.constant 0 : index
    %c0_0 = arith.constant 0 : index
    %0 = vector.load %arg2[%c0, %c0_0] : memref<2x1024xf32, #tpu.memory_space<vmem>>, vector<2x1024xf32>
    %c0_1 = arith.constant 0 : index
    %c0_2 = arith.constant 0 : index
    %1 = vector.load %arg3[%c0_1, %c0_2] : memref<2x1024xf32, #tpu.memory_space<vmem>>, vector<2x1024xf32>
    tpu.vector_store %arg3[%c0_1, %c0_2], %0 {strides = array<i32>} : memref<2x1024xf32, #tpu.memory_space<vmem>>, vector<2x1024xf32>,
    return
  }
  func.func @transform_0(%arg0: i32, %arg1: i32) -> (i32, i32) {
    %c0_i32 = arith.constant 0 : i32
    return %arg0, %arg1 : i32, i32
  }
  func.func @transform_1(%arg0: i32, %arg1: i32) -> (i32, i32) {
    %c0_i32 = arith.constant 0 : i32
    return %arg0, %arg1 : i32, i32
  }
}

</mosaic_0001>

<bundles_post_ra>
// kernel: flatten.1
= control target key start
LH: loop header
LB: loop body
LE: loop exit
PB: predicated region body
PF: predicated region fallthrough
CT: control target
= control target key end

     0   :  { %s76_s0 = inlined_call_operand.vmem [shape: f32[2,1024], index: 0, kind: input, shape index: {}]   ;;  %s77_s1 = inlined_call_operand.hbm [shape: f32[2,1024], index: 1, kind: output, shape index: {}]  }
   0x1   :  { %v9_v0 = vld [vmem:[%s76_s0] sm:$0xff]  ;;  %v10_v1 = vld [vmem:[%s76_s0 + $0x8] sm:$0xff] }
   0x2   :  { %6 = vsyncpa [#allocation3], 0  ;;  %s20_s12 = sshll.u32 %s77_s1, 4  ;;  %11 = vst [vmem:[#allocation2] sm:$0xff] %v9_v0  ;;  %s56_s13 = smov [#allocation2]   ;;  %s21_s12 = int_to_ptr.hbm [resolvable:$true] %s20_s12 }
   0x3   :  { %s18_s14 = sshll.u32 %s56_s13, 4  ;;  %12 = vst [vmem:[#allocation2 + $0x8] sm:$0xff] %v10_v1  ;;  %s19_s14 = int_to_ptr.vmem [resolvable:$true] %s18_s14 }
   0x4   :  { %23 = dma.vmem_to_hbm [thread:$0]  %s19_s14, 256, %s21_s12, [#allocation3]  }
   0x5   :  { %54 = dma.done.wait [#allocation3], 256  }
   0x6   :  { %55 = vsyncadd [#allocation3], 4294967040 }
   0x7   :  { %28 = vsyncpa [#allocation3], 1 }

</bundles_post_ra>
